<compile_context>
chip_gen: v6e
topology: v6e:2x2x1
jax: 0.10.0
libtpu: 0.0.40
codegen_flags: <defaults>
</compile_context>

<pallas_src>
import functools

import jax
import jax.numpy as jnp
from jax import lax
from jax.experimental import pallas as pl
from jax.experimental.pallas import tpu as pltpu


def _round_up(x, m):
    return ((x + m - 1) // m) * m


def _hfl_tile_kernel(ti_ref, tj_ref, tw_ref,              # scalar prefetch (SMEM)
                     x_i_ref, x_j_ref, m_i_ref, m_j_ref,  # VMEM inputs
                     out_ref,                             # (1, 8, 128) output block
                     acc_pos_ref, acc_neg_ref,            # (tm, tn) f32 scratch
                     *, tm, tn, s_steps, b_actual, batch_padded):
    p = pl.program_id(0)
    s = pl.program_id(1)
    flat = p * s_steps + s

    # Reset the per-chunk accumulators at the start of every parallel chunk.
    @pl.when(s == 0)
    def _():
        acc_pos_ref[...] = jnp.zeros_like(acc_pos_ref)
        acc_neg_ref[...] = jnp.zeros_like(acc_neg_ref)

    ti = ti_ref[flat]                       # row-tile index of this step
    tj = tj_ref[flat]                       # col-tile index of this step
    w = tw_ref[flat].astype(jnp.float32)    # 0: pad entry, 1: diag tile, 2: off-diag (symmetry)

    # Single MXU matmul per tile (bf16 in, f32 accumulate).
    gram = lax.dot_general(
        x_i_ref[...], x_j_ref[...],
        (((1,), (1,)), ((), ())),
        preferred_element_type=jnp.float32)               # (tm, tn)

    m_i = m_i_ref[...]                                    # (tm, 2): [:,0]=||x||^2, [:,1]=bits(label)
    m_j = m_j_ref[...]                                    # (2, tn)
    sq_i = m_i[:, 0:1]                                    # (tm, 1) f32
    sq_j = m_j[0:1, :]                                    # (1, tn) f32
    lab_i = pltpu.bitcast(m_i[:, 1:2], jnp.int32)         # (tm, 1) i32 (exact bits)
    lab_j = pltpu.bitcast(m_j[1:2, :], jnp.int32)         # (1, tn) i32

    d2 = sq_i + sq_j - 2.0 * gram
    dist = jnp.sqrt(jnp.maximum(d2, 1e-12))               # matches clamp(min=1e-12).sqrt()

    row_gid = ti * tm + lax.broadcasted_iota(jnp.int32, (tm, tn), 0)
    col_gid = tj * tn + lax.broadcasted_iota(jnp.int32, (tm, tn), 1)

    d = dist * w                                          # fold symmetry weight once
    if batch_padded:                                      # exact masking of padded rows/cols
        d = jnp.where((row_gid < b_actual) & (col_gid < b_actual), d, 0.0)

    same = lab_i == lab_j                                 # (tm, tn) bool
    # Pure-VPU accumulation; the expensive full reduction happens only once below.
    acc_pos_ref[...] += jnp.where(same & (row_gid != col_gid), d, 0.0)
    acc_neg_ref[...] += jnp.where(same, 0.0, d)

    # Finalize: one (tm, tn) -> scalar reduction per chunk, packed into
    # sublanes 0/1 of the (1, 8, 128) output block.
    @pl.when(s == pl.num_programs(1) - 1)
    def _():
        s_pos = jnp.sum(acc_pos_ref[...])
        s_neg = jnp.sum(acc_neg_ref[...])
        sub = lax.broadcasted_iota(jnp.int32, (1, 8, 128), 1)
        out_ref[...] = jnp.where(sub == 0, s_pos,
                                 jnp.where(sub == 1, s_neg, 0.0))


def hidden_feature_loss(embeddings, labels, margin=500, gram_dtype=jnp.bfloat16):
    # `margin` is unused in the reference PyTorch forward; kept for signature parity.
    del margin
    B, D = embeddings.shape
    x = embeddings.astype(jnp.float32)
    lab = labels.astype(jnp.int32)

    # ---- exact pair counts from the label histogram (wrapper-side, O(B log B)) ----
    srt = jnp.sort(lab)
    left = jnp.searchsorted(srt, srt, side="left")
    right = jnp.searchsorted(srt, srt, side="right")
    same_pairs = jnp.sum(right - left)                    # sum_c n_c^2 (exact int32)
    c_pos = (same_pairs - B).astype(jnp.float32)          # |mask_pos|
    c_neg = (B * B - same_pairs).astype(jnp.float32)      # |mask_neg|

    # ---- tiling ----
    Dp = _round_up(max(D, 1), 128)                        # lane-dense feature dim
    if B <= 256:
        TM = TN = _round_up(B, 8)                         # single tile
    else:
        # Moderate tiles: amortize the ~0.35us/step overhead (v5e/v6e) while
        # staying far below v7x's 64 MiB VMEM.  Megacore balance comes from
        # the parallel chunk axis, not from the row-tile count.
        TM = TN = 256 if B >= 1024 else 128
    Bp = _round_up(B, TM)
    # NOTE: for very large D (>= ~8k) a feature-axis grid split with an f32
    # gram accumulator would further bound VMEM; not needed at these shapes.

    # ---- pad only when needed (no full zero-init HBM round trip) ----
    xg = x.astype(gram_dtype)
    if Bp != B or Dp != D:
        xg = jnp.pad(xg, ((0, Bp - B), (0, Dp - D)))
    sq = jnp.sum(x * x, axis=1)                           # squared norms once, in f32
    if Bp != B:
        sq = jnp.pad(sq, (0, Bp - B))
        lab = jnp.pad(lab, (0, Bp - B))
    lab_bits = lax.bitcast_convert_type(lab, jnp.float32)  # exact int32 bits in an f32 carrier
    meta_row = jnp.stack([sq, lab_bits], axis=1)            # (Bp, 2): one DMA per row tile
    meta_col = jnp.stack([sq, lab_bits], axis=0)            # (2, Bp): one DMA per col tile

    # ---- upper-triangular tile schedule (symmetry -> ~2x less work) ----
    R = Bp // TM
    tri = [(i, j) for i in range(R) for j in range(i, R)]
    T = len(tri)
    P = 2 if T >= 2 else 1        # parallel chunks (feeds both v7x TensorCores)
    S = -(-T // P)                # tiles per chunk (ceil)
    pad = P * S - T
    ti_arr = jnp.asarray([i for i, _ in tri] + [0] * pad, jnp.int32)
    tj_arr = jnp.asarray([j for _, j in tri] + [0] * pad, jnp.int32)
    tw_arr = jnp.asarray([1 if i == j else 2 for i, j in tri] + [0] * pad, jnp.int32)

    kernel = functools.partial(
        _hfl_tile_kernel, tm=TM, tn=TN, s_steps=S,
        b_actual=B, batch_padded=(Bp != B))

    grid_spec = pltpu.PrefetchScalarGridSpec(
        num_scalar_prefetch=3,
        grid=(P, S),
        in_specs=[
            pl.BlockSpec((TM, Dp), lambda p, s, ti, tj, tw: (ti[p * S + s], 0)),
            pl.BlockSpec((TN, Dp), lambda p, s, ti, tj, tw: (tj[p * S + s], 0)),
            pl.BlockSpec((TM, 2), lambda p, s, ti, tj, tw: (ti[p * S + s], 0)),
            pl.BlockSpec((2, TN), lambda p, s, ti, tj, tw: (0, tj[p * S + s])),
        ],
        out_specs=pl.BlockSpec((1, 8, 128), lambda p, s, ti, tj, tw: (p, 0, 0)),
        scratch_shapes=[pltpu.VMEM((TM, TN), jnp.float32),
                        pltpu.VMEM((TM, TN), jnp.float32)],
    )

    parts = pl.pallas_call(
        kernel,
        out_shape=jax.ShapeDtypeStruct((P, 8, 128), jnp.float32),
        grid_spec=grid_spec,
        compiler_params=pltpu.CompilerParams(
            dimension_semantics=("parallel", "arbitrary"),
            vmem_limit_bytes=32 * 1024 * 1024,
        ),
    )(ti_arr, tj_arr, tw_arr, xg, xg, meta_row, meta_col)

    # ---- tiny epilogue: combine per-chunk partial sums into the scalar loss ----
    s_pos = jnp.sum(parts[:, 0, 0])
    s_neg = jnp.sum(parts[:, 1, 0])
    loss_pos = s_pos / c_pos          # NaN when there are no positive pairs (matches the reference)
    loss_neg = s_neg / c_neg
    return loss_pos + 10.0 / jnp.maximum(1.0, loss_neg)


def _reference(embeddings, labels):
    # Pure-JAX mirror of the PyTorch forward for the correctness check.
    x = embeddings.astype(jnp.float32)
    sq = jnp.sum(x * x, axis=1, keepdims=True)
    gram = jnp.matmul(x, x.T, precision=lax.Precision.HIGHEST)
    dist = jnp.sqrt(jnp.maximum(sq + sq.T - 2.0 * gram, 1e-12))
    Bn = x.shape[0]
    mask = (labels[:, None] == labels[None, :]).astype(jnp.float32)
    mask_pos = mask - jnp.eye(Bn, dtype=jnp.float32)
    mask_neg = 1.0 - mask
    loss_pos = jnp.sum(dist * mask_pos) / jnp.sum(mask_pos)
    loss_neg = jnp.sum(dist * mask_neg) / jnp.sum(mask_neg)
    return loss_pos + 10.0 / jnp.maximum(1.0, loss_neg)


if __name__ == "__main__":
    key = jax.random.PRNGKey(0)

    # Small config (single-tile path): batch of 8 embeddings, hidden size 32.
    B, D = 8, 32
    embeddings = jax.random.normal(key, (B, D), dtype=jnp.float32)
    labels = jnp.array([0, 1, 0, 1, 2, 2, 3, 3], dtype=jnp.int32)
    loss = jax.block_until_ready(jax.jit(hidden_feature_loss)(embeddings, labels))
    ref = jax.block_until_ready(_reference(embeddings, labels))
    assert jnp.allclose(loss, ref, rtol=1e-2, atol=1e-2), (loss, ref)

    # Larger config exercising the tiled / padded / symmetric path
    # (R=3 row tiles, triangle of 6 tiles on a (2, 3) grid).
    k1, k2 = jax.random.split(key)
    B2, D2 = 260, 96
    emb2 = jax.random.normal(k1, (B2, D2), dtype=jnp.float32)
    lab2 = jax.random.randint(k2, (B2,), 0, 6, dtype=jnp.int32)
    loss2 = jax.block_until_ready(jax.jit(hidden_feature_loss)(emb2, lab2))
    ref2 = jax.block_until_ready(_reference(emb2, lab2))
    assert jnp.allclose(loss2, ref2, rtol=1e-2, atol=1e-2), (loss2, ref2)

    # Exact-parity check with the f32 gram path.
    f32_fn = jax.jit(functools.partial(hidden_feature_loss, gram_dtype=jnp.float32))
    loss3 = jax.block_until_ready(f32_fn(emb2, lab2))
    assert jnp.allclose(loss3, ref2, rtol=1e-4, atol=1e-4), (loss3, ref2)

    print("KERNEL_OK")
</pallas_src>

<mosaic_0001>
module attributes {stable_mosaic.version = 11 : i64} {
  func.func @_hfl_tile_kernel(%arg0: i32, %arg1: i32, %arg2: memref<1xi32, #tpu.memory_space<smem>>, %arg3: memref<1xi32, #tpu.memory_space<smem>>, %arg4: memref<1xi32, #tpu.memory_space<smem>>, %arg5: memref<8x128xbf16, #tpu.memory_space<vmem>>, %arg6: memref<8x128xbf16, #tpu.memory_space<vmem>>, %arg7: memref<8x2xf32, #tpu.memory_space<vmem>>, %arg8: memref<2x8xf32, #tpu.memory_space<vmem>>, %arg9: memref<1x8x128xf32, #tpu.memory_space<vmem>>, %arg10: memref<8x8xf32, #tpu.memory_space<vmem>>, %arg11: memref<8x8xf32, #tpu.memory_space<vmem>>) attributes {dimension_semantics = [#tpu.dimension_semantics<parallel>, #tpu.dimension_semantics<arbitrary>], iteration_bounds = array<i64: 1, 1>, scalar_prefetch = 3 : i64, scratch_operands = 2 : i64, tpu.core_type = #tpu.core_type<tc>, window_params = [{transform_indices = @transform_0, window_bounds = array<i64: 8, 128>}, {transform_indices = @transform_1, window_bounds = array<i64: 8, 128>}, {transform_indices = @transform_2, window_bounds = array<i64: 8, 2>}, {transform_indices = @transform_3, window_bounds = array<i64: 2, 8>}, {transform_indices = @transform_4, window_bounds = array<i64: 1, 8, 128>}]} {
    %c1_i32 = arith.constant 1 : i32
    %0 = arith.muli %arg0, %c1_i32 : i32
    %1 = arith.addi %0, %arg1 : i32
    %c0_i32 = arith.constant 0 : i32
    %2 = arith.cmpi eq, %arg1, %c0_i32 : i32
    %3 = arith.extui %2 : i1 to i32
    %c0_i32_0 = arith.constant 0 : i32
    %4 = arith.cmpi ne, %3, %c0_i32_0 : i32
    scf.if %4 {
      %cst_23 = arith.constant 0.000000e+00 : f32
      %60 = vector.broadcast %cst_23 : f32 to vector<8x8xf32>
      %c0_24 = arith.constant 0 : index
      %c0_25 = arith.constant 0 : index
      %61 = vector.load %arg10[%c0_24, %c0_25] : memref<8x8xf32, #tpu.memory_space<vmem>>, vector<8x8xf32>
      tpu.vector_store %arg10[%c0_24, %c0_25], %60 {strides = array<i32>} : memref<8x8xf32, #tpu.memory_space<vmem>>, vector<8x8xf32>,
      %cst_26 = arith.constant 0.000000e+00 : f32
      %62 = vector.broadcast %cst_26 : f32 to vector<8x8xf32>
      %c0_27 = arith.constant 0 : index
      %c0_28 = arith.constant 0 : index
      %63 = vector.load %arg11[%c0_27, %c0_28] : memref<8x8xf32, #tpu.memory_space<vmem>>, vector<8x8xf32>
      tpu.vector_store %arg11[%c0_27, %c0_28], %62 {strides = array<i32>} : memref<8x8xf32, #tpu.memory_space<vmem>>, vector<8x8xf32>,
    } else {
    }
    %5 = arith.index_cast %1 : i32 to index
    %6 = memref.load %arg2[%5] : memref<1xi32, #tpu.memory_space<smem>>
    %7 = arith.index_cast %1 : i32 to index
    %8 = memref.load %arg3[%7] : memref<1xi32, #tpu.memory_space<smem>>
    %9 = arith.index_cast %1 : i32 to index
    %10 = memref.load %arg4[%9] : memref<1xi32, #tpu.memory_space<smem>>
    %11 = arith.sitofp %10 : i32 to f32
    %c0 = arith.constant 0 : index
    %c0_1 = arith.constant 0 : index
    %12 = vector.load %arg5[%c0, %c0_1] : memref<8x128xbf16, #tpu.memory_space<vmem>>, vector<8x128xbf16>
    %c0_2 = arith.constant 0 : index
    %c0_3 = arith.constant 0 : index
    %13 = vector.load %arg6[%c0_2, %c0_3] : memref<8x128xbf16, #tpu.memory_space<vmem>>, vector<8x128xbf16>
    %cst = arith.constant dense<0.000000e+00> : vector<8x8xf32>
    %14 = tpu.matmul %12, %13, %cst {dimension_numbers = #tpu.dot_dimension_numbers<[1], [1], [0], [0], [0, 0, 1, 0], [], []>} : vector<8x128xbf16>, vector<8x128xbf16>, vector<8x8xf32> -> vector<8x8xf32>
    %c0_4 = arith.constant 0 : index
    %c0_5 = arith.constant 0 : index
    %15 = vector.load %arg7[%c0_4, %c0_5] : memref<8x2xf32, #tpu.memory_space<vmem>>, vector<8x2xf32>
    %c0_6 = arith.constant 0 : index
    %c0_7 = arith.constant 0 : index
    %16 = vector.load %arg8[%c0_6, %c0_7] : memref<2x8xf32, #tpu.memory_space<vmem>>, vector<2x8xf32>
    %17 = vector.extract_strided_slice %15 {offsets = [0, 0], sizes = [8, 1], strides = [1, 1]} : vector<8x2xf32> to vector<8x1xf32>
    %18 = vector.extract_strided_slice %16 {offsets = [0, 0], sizes = [1, 8], strides = [1, 1]} : vector<2x8xf32> to vector<1x8xf32>
    %19 = vector.extract_strided_slice %15 {offsets = [0, 1], sizes = [8, 1], strides = [1, 1]} : vector<8x2xf32> to vector<8x1xf32>
    %20 = tpu.bitcast %19 : vector<8x1xf32> -> vector<8x1xi32>
    %21 = vector.extract_strided_slice %16 {offsets = [1, 0], sizes = [1, 8], strides = [1, 1]} : vector<2x8xf32> to vector<1x8xf32>
    %22 = tpu.bitcast %21 : vector<1x8xf32> -> vector<1x8xi32>
    %23 = vector.broadcast %17 : vector<8x1xf32> to vector<8x8xf32>
    %24 = vector.broadcast %18 : vector<1x8xf32> to vector<8x8xf32>
    %25 = arith.addf %23, %24 : vector<8x8xf32>
    %cst_8 = arith.constant 2.000000e+00 : f32
    %26 = vector.broadcast %cst_8 : f32 to vector<8x8xf32>
    %27 = arith.mulf %26, %14 : vector<8x8xf32>
    %28 = arith.subf %25, %27 : vector<8x8xf32>
    %cst_9 = arith.constant 9.99999996E-13 : f32
    %29 = vector.broadcast %cst_9 : f32 to vector<8x8xf32>
    %30 = arith.maximumf %28, %29 : vector<8x8xf32>
    %31 = math.sqrt %30 : vector<8x8xf32>
    %c8_i32 = arith.constant 8 : i32
    %32 = arith.muli %6, %c8_i32 : i32
    %33 = tpu.iota {dimensions = array<i32: 0>} : vector<8x8xi32>
    %34 = vector.broadcast %32 : i32 to vector<8x8xi32>
    %35 = arith.addi %34, %33 : vector<8x8xi32>
    %c8_i32_10 = arith.constant 8 : i32
    %36 = arith.muli %8, %c8_i32_10 : i32
    %37 = tpu.iota {dimensions = array<i32: 1>} : vector<8x8xi32>
    %38 = vector.broadcast %36 : i32 to vector<8x8xi32>
    %39 = arith.addi %38, %37 : vector<8x8xi32>
    %40 = vector.broadcast %11 : f32 to vector<8x8xf32>
    %41 = arith.mulf %31, %40 : vector<8x8xf32>
    %42 = vector.broadcast %20 : vector<8x1xi32> to vector<8x8xi32>
    %43 = vector.broadcast %22 : vector<1x8xi32> to vector<8x8xi32>
    %44 = arith.cmpi eq, %42, %43 : vector<8x8xi32>
    %c0_11 = arith.constant 0 : index
    %c0_12 = arith.constant 0 : index
    %45 = vector.load %arg10[%c0_11, %c0_12] : memref<8x8xf32, #tpu.memory_space<vmem>>, vector<8x8xf32>
    %46 = arith.cmpi ne, %35, %39 : vector<8x8xi32>
    %47 = arith.andi %44, %46 : vector<8x8xi1>
    %cst_13 = arith.constant 0.000000e+00 : f32
    %48 = vector.broadcast %cst_13 : f32 to vector<8x8xf32>
    %49 = arith.select %47, %41, %48 : vector<8x8xi1>, vector<8x8xf32>
    %50 = arith.addf %45, %49 : vector<8x8xf32>
    %c0_14 = arith.constant 0 : index
    %c0_15 = arith.constant 0 : index
    %51 = vector.load %arg10[%c0_14, %c0_15] : memref<8x8xf32, #tpu.memory_space<vmem>>, vector<8x8xf32>
    tpu.vector_store %arg10[%c0_14, %c0_15], %50 {strides = array<i32>} : memref<8x8xf32, #tpu.memory_space<vmem>>, vector<8x8xf32>,
    %c0_16 = arith.constant 0 : index
    %c0_17 = arith.constant 0 : index
    %52 = vector.load %arg11[%c0_16, %c0_17] : memref<8x8xf32, #tpu.memory_space<vmem>>, vector<8x8xf32>
    %cst_18 = arith.constant 0.000000e+00 : f32
    %53 = vector.broadcast %cst_18 : f32 to vector<8x8xf32>
    %54 = arith.select %44, %53, %41 : vector<8x8xi1>, vector<8x8xf32>
    %55 = arith.addf %52, %54 : vector<8x8xf32>
    %c0_19 = arith.constant 0 : index
    %c0_20 = arith.constant 0 : index
    %56 = vector.load %arg11[%c0_19, %c0_20] : memref<8x8xf32, #tpu.memory_space<vmem>>, vector<8x8xf32>
    tpu.vector_store %arg11[%c0_19, %c0_20], %55 {strides = array<i32>} : memref<8x8xf32, #tpu.memory_space<vmem>>, vector<8x8xf32>,
    %c0_i32_21 = arith.constant 0 : i32
    %57 = arith.cmpi eq, %arg1, %c0_i32_21 : i32
    %58 = arith.extui %57 : i1 to i32
    %c0_i32_22 = arith.constant 0 : i32
    %59 = arith.cmpi ne, %58, %c0_i32_22 : i32
    scf.if %59 {
      %c0_23 = arith.constant 0 : index
      %c0_24 = arith.constant 0 : index
      %60 = vector.load %arg10[%c0_23, %c0_24] : memref<8x8xf32, #tpu.memory_space<vmem>>, vector<8x8xf32>
      %61 = vector.shape_cast %60 : vector<8x8xf32> to vector<1x8x8xf32>
      %cst_25 = arith.constant dense<0.000000e+00> : vector<1xf32>
      %62 = vector.multi_reduction <add>, %61, %cst_25 [1, 2] : vector<1x8x8xf32> to vector<1xf32>
      %63 = vector.shape_cast %62 : vector<1xf32> to vector<1x1x1xf32>
      %64 = vector.extract %63[0, 0, 0] : f32 from vector<1x1x1xf32>
      %c0_26 = arith.constant 0 : index
      %c0_27 = arith.constant 0 : index
      %65 = vector.load %arg11[%c0_26, %c0_27] : memref<8x8xf32, #tpu.memory_space<vmem>>, vector<8x8xf32>
      %66 = vector.shape_cast %65 : vector<8x8xf32> to vector<1x8x8xf32>
      %cst_28 = arith.constant dense<0.000000e+00> : vector<1xf32>
      %67 = vector.multi_reduction <add>, %66, %cst_28 [1, 2] : vector<1x8x8xf32> to vector<1xf32>
      %68 = vector.shape_cast %67 : vector<1xf32> to vector<1x1x1xf32>
      %69 = vector.extract %68[0, 0, 0] : f32 from vector<1x1x1xf32>
      %70 = tpu.iota {dimensions = array<i32: 1>} : vector<1x8x128xi32>
      %c0_i32_29 = arith.constant 0 : i32
      %71 = vector.broadcast %c0_i32_29 : i32 to vector<1x8x128xi32>
      %72 = arith.cmpi eq, %70, %71 : vector<1x8x128xi32>
      %c1_i32_30 = arith.constant 1 : i32
      %73 = vector.broadcast %c1_i32_30 : i32 to vector<1x8x128xi32>
      %74 = arith.cmpi eq, %70, %73 : vector<1x8x128xi32>
      %cst_31 = arith.constant 0.000000e+00 : f32
      %75 = vector.broadcast %69 : f32 to vector<1x8x128xf32>
      %76 = vector.broadcast %cst_31 : f32 to vector<1x8x128xf32>
      %77 = arith.select %74, %75, %76 : vector<1x8x128xi1>, vector<1x8x128xf32>
      %78 = vector.broadcast %64 : f32 to vector<1x8x128xf32>
      %79 = arith.select %72, %78, %77 : vector<1x8x128xi1>, vector<1x8x128xf32>
      %c0_32 = arith.constant 0 : index
      %c0_33 = arith.constant 0 : index
      %c0_34 = arith.constant 0 : index
      %80 = vector.load %arg9[%c0_32, %c0_33, %c0_34] : memref<1x8x128xf32, #tpu.memory_space<vmem>>, vector<1x8x128xf32>
      tpu.vector_store %arg9[%c0_32, %c0_33, %c0_34], %79 {strides = array<i32>} : memref<1x8x128xf32, #tpu.memory_space<vmem>>, vector<1x8x128xf32>,
    } else {
    }
    return
  }
  func.func @transform_0(%arg0: i32, %arg1: i32, %arg2: memref<1xi32, #tpu.memory_space<smem>>, %arg3: memref<1xi32, #tpu.memory_space<smem>>, %arg4: memref<1xi32, #tpu.memory_space<smem>>) -> (i32, i32) {
    %c1_i32 = arith.constant 1 : i32
    %0 = arith.muli %arg0, %c1_i32 : i32
    %1 = arith.addi %0, %arg1 : i32
    %2 = arith.index_cast %1 : i32 to index
    %3 = memref.load %arg2[%2] : memref<1xi32, #tpu.memory_space<smem>>
    %c0_i32 = arith.constant 0 : i32
    %c0_i32_0 = arith.constant 0 : i32
    return %3, %c0_i32 : i32, i32
  }
  func.func @transform_1(%arg0: i32, %arg1: i32, %arg2: memref<1xi32, #tpu.memory_space<smem>>, %arg3: memref<1xi32, #tpu.memory_space<smem>>, %arg4: memref<1xi32, #tpu.memory_space<smem>>) -> (i32, i32) {
    %c1_i32 = arith.constant 1 : i32
    %0 = arith.muli %arg0, %c1_i32 : i32
    %1 = arith.addi %0, %arg1 : i32
    %2 = arith.index_cast %1 : i32 to index
    %3 = memref.load %arg3[%2] : memref<1xi32, #tpu.memory_space<smem>>
    %c0_i32 = arith.constant 0 : i32
    %c0_i32_0 = arith.constant 0 : i32
    return %3, %c0_i32 : i32, i32
  }
  func.func @transform_2(%arg0: i32, %arg1: i32, %arg2: memref<1xi32, #tpu.memory_space<smem>>, %arg3: memref<1xi32, #tpu.memory_space<smem>>, %arg4: memref<1xi32, #tpu.memory_space<smem>>) -> (i32, i32) {
    %c1_i32 = arith.constant 1 : i32
    %0 = arith.muli %arg0, %c1_i32 : i32
    %1 = arith.addi %0, %arg1 : i32
    %2 = arith.index_cast %1 : i32 to index
    %3 = memref.load %arg2[%2] : memref<1xi32, #tpu.memory_space<smem>>
    %c0_i32 = arith.constant 0 : i32
    %c0_i32_0 = arith.constant 0 : i32
    return %3, %c0_i32 : i32, i32
  }
  func.func @transform_3(%arg0: i32, %arg1: i32, %arg2: memref<1xi32, #tpu.memory_space<smem>>, %arg3: memref<1xi32, #tpu.memory_space<smem>>, %arg4: memref<1xi32, #tpu.memory_space<smem>>) -> (i32, i32) {
    %c1_i32 = arith.constant 1 : i32
    %0 = arith.muli %arg0, %c1_i32 : i32
    %1 = arith.addi %0, %arg1 : i32
    %2 = arith.index_cast %1 : i32 to index
    %3 = memref.load %arg3[%2] : memref<1xi32, #tpu.memory_space<smem>>
    %c0_i32 = arith.constant 0 : i32
    %c0_i32_0 = arith.constant 0 : i32
    return %c0_i32, %3 : i32, i32
  }
  func.func @transform_4(%arg0: i32, %arg1: i32, %arg2: memref<1xi32, #tpu.memory_space<smem>>, %arg3: memref<1xi32, #tpu.memory_space<smem>>, %arg4: memref<1xi32, #tpu.memory_space<smem>>) -> (i32, i32, i32) {
    %c0_i32 = arith.constant 0 : i32
    %c0_i32_0 = arith.constant 0 : i32
    %c0_i32_1 = arith.constant 0 : i32
    return %arg0, %c0_i32, %c0_i32_0 : i32, i32, i32
  }
}

</mosaic_0001>

<bundles_post_ra>
// kernel: custom-call
= control target key start
LH: loop header
LB: loop body
LE: loop exit
PB: predicated region body
PF: predicated region fallthrough
CT: control target
= control target key end

     0   :  { %s6_s0 = inlined_call_operand.vmem [shape: u32[8], index: 0, kind: output, shape index: {}]  }

// kernel: hidden_feature_loss.1
= control target key start
LH: loop header
LB: loop body
LE: loop exit
PB: predicated region body
PF: predicated region fallthrough
CT: control target
= control target key end

     0   :  { %vm117_vm0 = vcmask 64512   ;;  %v306_v0 = vmov 0.0   ;;  %vm307_vm1 = vmmov 0   ;;  %v308_v1 = vmov 0   ;;  %s399_s1 = inlined_call_operand.<no memory space> [shape: s32[1], index: 1, kind: input, shape index: {}, may-alias: {0,1}]   ;;  %s400_s0 = inlined_call_operand.<no memory space> [shape: s32[1], index: 0, kind: input, shape index: {}, may-alias: {0,1}]   ;;  %s401_s4 = inlined_call_operand.vmem [shape: bf16[8,128], index: 4, kind: input, shape index: {}, may-alias: {3,4}]   ;;  %s402_s5 = inlined_call_operand.vmem [shape: f32[8,2], index: 5, kind: input, shape index: {}]   ;;  %s403_s3 = inlined_call_operand.vmem [shape: bf16[8,128], index: 3, kind: input, shape index: {}, may-alias: {3,4}]   ;;  %s404_s6 = inlined_call_operand.vmem [shape: f32[2,8], index: 6, kind: input, shape index: {}]   ;;  %s405_s2 = inlined_call_operand.<no memory space> [shape: s32[1], index: 2, kind: input, shape index: {}]   ;;  %s406_s7 = inlined_call_operand.vmem [shape: f32[1,8,128], index: 7, kind: output, shape index: {}]  }
   0x1   :  { %118 = vst.msk [vmem:[#allocation2] sm:$0xff] %vm117_vm0, %v306_v0  ;;  %119 = vst.msk [vmem:[#allocation3] sm:$0xff] %vm117_vm0, %v306_v0  ;;  %288 = vmatprep.subr.bf16.mxu0 %v306_v0  ;;  %p89_p0 = scmp.lt.s32.totalorder %s399_s1, 0  ;;  %290 = vmatprep.mubr.msk.bf16.mxu0 %vm307_vm1, %v306_v0  ;;  %p81_p1 = scmp.lt.s32.totalorder %s400_s0, 0  ;;  %v309_v5 = vmov 1   ;;  %v174_v6 = vlaneseq }
   0x2   :  { %302 = vset.pattern.permute.xlu0 %v308_v1  ;;  %s284_s26 = sshll.u32 %s400_s0, 3  ;;  %s285_s28 = sshll.u32 %s399_s1, 3 }
   0x3   :  { %s90_s30 = scalar_select %p89_p0, %s399_s1, 0  ;;  %v373_v7 = vshrl.u32 %v174_v6, 7  ;;  %v196_v20 = vand.u32 127, %v174_v6  ;;  %v192_v22 = vstv %s284_s26  ;;  %v197_v23 = vstv %s285_s28 }
   0x4   :  { %s82_s10 = scalar_select %p81_p1, %s400_s0, 0 }
   0x5   :  { %s281_s11 = sshll.u32 %s90_s30, 2  ;;  %v176_v8 = vsub.s32 0, %v373_v7  ;;  %v206_v21 = vsub.s32 1, %v373_v7  ;;  %v193_v24 = vadd.s32 %v192_v22, %v373_v7  ;;  %v198_v25 = vadd.s32 %v197_v23, %v196_v20  ;;  %s123_s8 = scvt.s32.f32 %s405_s2 }
   0x6   :  { %s92_s14 = scalar_lea.vmem %s401_s4, %s281_s11  ;;  %s280_s15 = sshll.u32 %s82_s10, 2  ;;  %vm246_vm7 = vcmp.eq.s32.totalorder %v373_v7, 1  ;;  %vm245_vm8 = vcmp.eq.s32.totalorder %v373_v7, 0 }
   0x7   :  { %v125_v2 = vld [vmem:[%s92_s14] sm:$0xf]  ;;  %s282_s16 = sshll.u32 %s82_s10, 3  ;;  %s84_s22 = scalar_lea.vmem %s403_s3, %s280_s15  ;;  %vm210_vm2 = vcmp.ne.s32.totalorder %v193_v24, %v198_v25  ;;  %v199_v30 = vstv %s123_s8 }
   0x8   :  { %289 = vmatpush3.bf16.xpose.msra.mxu0 %v125_v2  ;;  %s100_s19 = scalar_lea.vmem %s402_s5, %s282_s16  ;;  %v124_v4 = vld [vmem:[%s84_s22] sm:$0xf]  ;;  %s283_s4 = sshll.u32 %s90_s30, 1  ;;  %v216_v35 = vld [vmem:[#allocation3] sm:$0xff] }
   0x9   :  { %v166_v3 = vld [vmem:[%s100_s19] sm:$0xff]  ;;  %s108_s25 = scalar_lea.vmem %s404_s6, %s283_s4 }
   0xa   :  { %171 = vperm.xlu0 %302, %v166_v3   ;;  %v167_v9 = vld [vmem:[%s108_s25] sm:$0x3] }
   0xb   :  { %v177_v10 = vrot.slane %v167_v9, %v176_v8  ;;  %v207_v26 = vrot.slane %v167_v9, %v206_v21  ;;  %v209_v34 = vld [vmem:[#allocation2] sm:$0xff] }
   0xe   :  { %303 = vset.pattern.permute.xlu0 %v309_v5 }
   0xf   :  { %291 = vmatmul.mubr.bf16.vlgmr.msra.gmra.mxu0 %v124_v4  ;;  %202 = vperm.xlu0 %303, %v166_v3  }
  0x85   :  { %v172_v11 = vpop.permute.xlu0 %171 }
  0x86   :  { %v178_v12 = vadd.f32 %v177_v10, %v172_v11 }
  0x8a   :  { %v203_v27 = vpop.permute.xlu0 %202 }
  0x8b   :  { %vm208_vm3 = vcmp.eq.s32.totalorder %v203_v27, %v207_v26 }
  0x8c   :  { %vm211_vm6 = vmand %vm208_vm3, %vm210_vm2 }
  0xcf   :  { %v160_v13 = vpop.f32.mrf.mxu0 }
  0xd0   :  { %v179_v14 = vmul.f32 2.0, %v160_v13 }
  0xd1   :  { %v292_v15 = vpop.f32.mrf.mxu0 }
  0xd2   :  { %v180_v16 = vsub.f32 %v178_v12, %v179_v14 }
  0xd3   :  { %v163_v17 = vpop.f32.mrf.mxu0 }
  0xd4   :  { %v181_v18 = vmax.f32 %v180_v16, 1e-12 }
  0xd5   :  { %v293_v19 = vpop.f32.mrf.mxu0 }
  0xd6   :  { %304 = vrsqrt.f32 %v181_v18  ;;  %vm184_vm4 = vcmp.eq.f32.partialorder %v181_v18, inf  ;;  %v187_v31 = vand.u32 2147483648, %v181_v18  ;;  %vm186_vm5 = vcmp.eq.f32.partialorder %v181_v18, 0.0 }
  0xe3   :  { %v305_v28 = vpop.eup %304 }
  0xe4   :  { %v183_v29 = vmul.f32 %v305_v28, %v181_v18 }
  0xe6   :  { %v185_v32 = vsel %vm184_vm4, %v181_v18, %v183_v29 }
  0xe7   :  { %v188_v33 = vsel %vm186_vm5, %v187_v31, %v185_v32 }
  0xe8   :  { %v200_v36 = vmul.f32 %v199_v30, %v188_v33 }
  0xea   :  { %v212_v37 = vsel %vm211_vm6, %v200_v36, 0.0  ;;  %v217_v38 = vsel %vm208_vm3, 0.0, %v200_v36 }
  0xeb   :  { %v213_v39 = vadd.f32 %v212_v37, %v209_v34  ;;  %v218_v40 = vadd.f32 %v217_v38, %v216_v35 }
  0xed   :  { %215 = vst.msk [vmem:[#allocation2] sm:$0xff] %vm117_vm0, %v213_v39  ;;  %219 = vst.msk [vmem:[#allocation3] sm:$0xff] %vm117_vm0, %v218_v40 }
  0xf4   :  { %v223_v41 = vld [vmem:[#allocation2] sm:$0xff]  ;;  %v234_v43 = vld [vmem:[#allocation3] sm:$0xff] }
  0xf5   :  { %v224_v42 = vsel %vm117_vm0, %v223_v41, 0.0  ;;  %v235_v44 = vsel %vm117_vm0, %v234_v43, 0.0 }
  0xf6   :  { %225 = vadd.xlane.f32.xlu1 %v224_v42 }
  0xfa   :  { %236 = vadd.xlane.f32.xlu1 %v235_v44 }
 0x17f   :  { %v226_v45 = vpop.xlane.xlu1 %225 }
 0x180   :  { %v227_v46 = vrot.slane %v226_v45, 4 }
 0x182   :  { %v228_v47 = vadd.f32 %v227_v46, %v226_v45 }
 0x183   :  { %v237_v48 = vpop.xlane.xlu1 %236 }
 0x184   :  { %v229_v49 = vrot.slane %v228_v47, 2  ;;  %v238_v50 = vrot.slane %v237_v48, 4 }
 0x186   :  { %v239_v51 = vadd.f32 %v238_v50, %v237_v48  ;;  %v230_v52 = vadd.f32 %v229_v49, %v228_v47 }
 0x188   :  { %v240_v53 = vrot.slane %v239_v51, 2  ;;  %v231_v54 = vrot.slane %v230_v52, 1 }
 0x18a   :  { %v241_v55 = vadd.f32 %v240_v53, %v239_v51  ;;  %v232_v56 = vadd.f32 %v231_v54, %v230_v52 }
 0x18c   :  { %294 = vpush %v232_v56  ;;  %v242_v57 = vrot.slane %v241_v55, 1 }
 0x18e   :  { %v243_v58 = vadd.f32 %v242_v57, %v241_v55 }
 0x190   :  { %296 = vpush %v243_v58 }
 0x1bd   :  { %s295_s0 = spop %294 }
 0x1be   :  { %v249_v60 = vstv %s295_s0 }
 0x1c1   :  { %s297_s1 = spop %296 }
 0x1c2   :  { %v247_v59 = vstv %s297_s1 }
 0x1c3   :  { %v248_v61 = vsel %vm246_vm7, %v247_v59, 0.0 }
 0x1c4   :  { %v250_v62 = vsel %vm245_vm8, %v249_v60, %v248_v61 }
 0x1c5   :  { %251 = vst [vmem:[%s406_s7] sm:$0xff] %v250_v62 }

</bundles_post_ra>
